<compile_context>
chip_gen: v7x
topology: tpu7x:2x2x1
jax: 0.10.0
libtpu: 0.0.40
codegen_flags: <defaults>
</compile_context>

<pallas_src>
import functools

import jax
import jax.numpy as jnp
from jax import lax
from jax.experimental import pallas as pl
from jax.experimental.pallas import tpu as pltpu

BN_EPS = 1e-5


def _round_up(x, m):
    return (x + m - 1) // m * m


def _full_spec(shape):
    n = len(shape)
    return pl.BlockSpec(shape, lambda *_, n=n: (0,) * n)


# ---------------------------------------------------------------------------
# Fused kernel: both branches (collapsed to pooled form) + classifier
# ---------------------------------------------------------------------------
def ncnv0_kernel(
    x_ref,     # (2B, C, H*W)  lane-dense, branch-stacked input (left rows first)
    amap_ref,  # (C, H*W)      BN-folded depthwise spatial weight map
    pvec_ref,  # (R, C)        packed params: wp, w2, w1^T, biases, wcL^T, wcR^T
    out_ref,   # (B, NC)
    *,
    B,         # static: per-branch batch
    Cr,        # static: SE reduced channels
    rows,      # static: (r_wp, r_w2, r_w1t, r_vec, r_wcl, r_wcr)
):
    B2, C, HW = x_ref.shape
    NC = out_ref.shape[1]
    inv_hw = 1.0 / float(HW)
    r_wp, r_w2, r_w1t, r_vec, r_wcl, r_wcr = rows

    # --- the only full-size work: two lane-axis reductions over (2B, C, HW) ---
    amap = amap_ref[...]                                       # (C, HW)
    s_full = jnp.sum(x_ref[...], axis=-1)                      # (2B, C)
    wsum = jnp.sum(x_ref[...] * amap, axis=-1)                 # (2B, C)

    gap_x = s_full * inv_hw                                    # mean(x, spatial)

    # --- unpack tiny params from the packed slab ---
    wp = pvec_ref[r_wp:r_wp + C, :]                            # (C, C)
    w2 = pvec_ref[r_w2:r_w2 + Cr, :]                           # (Cr, C)
    w1t = pvec_ref[r_w1t:r_w1t + Cr, :]                        # (Cr, C) = w1^T
    bdp = pvec_ref[r_vec:r_vec + 1, :]                         # (1, C) bd+bp (BN-folded)
    b2 = pvec_ref[r_vec + 1:r_vec + 2, :]                      # (1, C)
    b1 = pvec_ref[r_vec + 2:r_vec + 3, 0:Cr]                   # (1, Cr)
    bc = pvec_ref[r_vec + 3:r_vec + 4, 0:NC]                   # (1, NC)
    wclt = pvec_ref[r_wcl:r_wcl + NC, :]                       # (NC, C) = wc[:C]^T
    wcrt = pvec_ref[r_wcr:r_wcr + NC, :]                       # (NC, C) = wc[C:]^T

    # --- attention weight (mean of BN_d(dconv) + mean of BN_p(pconv)) ---
    pre = (wsum * inv_hw
           + jnp.dot(gap_x, wp, preferred_element_type=jnp.float32)
           + bdp)
    w_att = jax.nn.sigmoid(pre)                                # (2B, C)
    gap_att = gap_x * w_att                                    # mean(x_att, spatial)

    # --- SE block on pooled features ---
    h1 = jnp.maximum(
        lax.dot_general(gap_att, w1t, (((1,), (1,)), ((), ())),
                        preferred_element_type=jnp.float32) + b1, 0.0)   # (2B, Cr)
    y = jax.nn.sigmoid(
        jnp.dot(h1, w2, preferred_element_type=jnp.float32) + b2)        # (2B, C)
    pooled = gap_att * y                                       # mean(x_se, spatial)

    # --- classifier on concat(pooled_left, pooled_right) without a concat ---
    logits = (lax.dot_general(pooled[:B], wclt, (((1,), (1,)), ((), ())),
                              preferred_element_type=jnp.float32)
              + lax.dot_general(pooled[B:], wcrt, (((1,), (1,)), ((), ())),
                                preferred_element_type=jnp.float32)
              + bc)
    out_ref[...] = logits


# ---------------------------------------------------------------------------
# Parameters (deterministic, mirrors the PyTorch module shapes)
# ---------------------------------------------------------------------------
def init_params(key, channels, num_classes, reduction=16):
    cr = channels // reduction
    keys = jax.random.split(key, 8)
    p = {}
    # AttentionBlock
    p["kd"] = 0.1 * jax.random.normal(keys[0], (3, 3, channels), jnp.float32)
    p["bd"] = 0.05 * jax.random.normal(keys[1], (1, channels), jnp.float32)
    p["wp"] = 0.1 * jax.random.normal(keys[2], (channels, channels), jnp.float32)
    p["bp"] = 0.05 * jax.random.normal(keys[3], (1, channels), jnp.float32)
    for tag in ("d", "p"):  # BatchNorm defaults: gamma=1, beta=0, mean=0, var=1
        p[f"g{tag}"] = jnp.ones((1, channels), jnp.float32)
        p[f"be{tag}"] = jnp.zeros((1, channels), jnp.float32)
        p[f"m{tag}"] = jnp.zeros((1, channels), jnp.float32)
        p[f"v{tag}"] = jnp.ones((1, channels), jnp.float32)
    # SENetBlock
    p["w1"] = 0.1 * jax.random.normal(keys[4], (channels, cr), jnp.float32)
    p["b1"] = jnp.zeros((1, cr), jnp.float32)
    p["w2"] = 0.1 * jax.random.normal(keys[5], (cr, channels), jnp.float32)
    p["b2"] = jnp.zeros((1, channels), jnp.float32)
    # classifier
    p["wc"] = 0.1 * jax.random.normal(keys[6], (2 * channels, num_classes),
                                      jnp.float32)
    p["bc"] = 0.05 * jax.random.normal(keys[7], (1, num_classes), jnp.float32)
    return p


def _fold_params(p, H, W):
    """Fold BatchNorm into the convs, build the depthwise spatial weight map,
    and pack all small params into one (R, C) slab."""
    C = p["wp"].shape[0]
    Cr = p["w1"].shape[1]
    NC = p["wc"].shape[1]
    assert Cr <= C and NC <= C, "pvec packing assumes Cr, NC <= C"

    scale_d = p["gd"] * lax.rsqrt(p["vd"] + BN_EPS)        # (1, C)
    kd_f = p["kd"] * scale_d                               # (3, 3, C)
    bd_f = (p["bd"] - p["md"]) * scale_d + p["bed"]        # (1, C)
    scale_p = p["gp"] * lax.rsqrt(p["vp"] + BN_EPS)        # (1, C)
    wp_f = p["wp"] * scale_p                               # (C, C), scales out-channel
    bp_f = (p["bp"] - p["mp"]) * scale_p + p["bep"]        # (1, C)
    bdp = bd_f + bp_f                                      # (1, C)

    # Spatial weight map A[c, i*W+j]: sum over the (clipped) 3x3 taps whose
    # output window covers pixel (i, j).  Then
    #   mean_spatial(BN_d(dconv(x)))[b, c] = inv_hw * sum_s A[c, s] x[b, c, s] + bd_f[c].
    A = jnp.zeros((H, W, C), jnp.float32)
    for dh in range(3):
        for dw in range(3):
            r0, r1 = max(0, dh - 1), min(H, H + dh - 1)
            c0, c1 = max(0, dw - 1), min(W, W + dw - 1)
            A = A.at[r0:r1, c0:c1, :].add(kd_f[dh, dw, :])
    amap = A.reshape(H * W, C).T                           # (C, H*W)

    # Packed parameter slab (R, C): 8-aligned block starts where it matters.
    r_wp = 0
    r_w2 = C
    r_w1t = C + Cr
    r_vec = C + 2 * Cr                                     # 4 bias rows
    r_wcl = _round_up(r_vec + 4, 8)
    r_wcr = r_wcl + NC
    R = _round_up(r_wcr + NC, 8)

    def pad_lanes(v):  # (1, k) -> (C,)
        return jnp.pad(v[0], (0, C - v.shape[1]))

    pvec = jnp.zeros((R, C), jnp.float32)
    pvec = pvec.at[r_wp:r_wp + C, :].set(wp_f)
    pvec = pvec.at[r_w2:r_w2 + Cr, :].set(p["w2"])
    pvec = pvec.at[r_w1t:r_w1t + Cr, :].set(p["w1"].T)
    pvec = pvec.at[r_vec, :].set(bdp[0])
    pvec = pvec.at[r_vec + 1, :].set(p["b2"][0])
    pvec = pvec.at[r_vec + 2, :].set(pad_lanes(p["b1"]))
    pvec = pvec.at[r_vec + 3, :].set(pad_lanes(p["bc"]))
    pvec = pvec.at[r_wcl:r_wcl + NC, :].set(p["wc"][:C].T)
    pvec = pvec.at[r_wcr:r_wcr + NC, :].set(p["wc"][C:].T)

    rows = (r_wp, r_w2, r_w1t, r_vec, r_wcl, r_wcr)
    return amap, pvec, rows


# ---------------------------------------------------------------------------
# Forward pass: single pallas_call, 3 input DMAs + 1 output DMA
# ---------------------------------------------------------------------------
@jax.jit
def ncnv0_forward(x_left, x_right, params):
    xl = x_left.astype(jnp.float32)
    xr = x_right.astype(jnp.float32)
    B, C, H, W = xl.shape
    num_classes = params["wc"].shape[1]
    Cr = params["w1"].shape[1]

    # Lane-dense, branch-stacked input: (2B, C, H*W); spatial axis on lanes.
    x = jnp.concatenate([xl, xr], axis=0).reshape(2 * B, C, H * W)

    amap, pvec, rows = _fold_params(params, H, W)

    kernel = functools.partial(ncnv0_kernel, B=B, Cr=Cr, rows=rows)

    return pl.pallas_call(
        kernel,
        grid=(1,),
        in_specs=[_full_spec(x.shape), _full_spec(amap.shape),
                  _full_spec(pvec.shape)],
        out_specs=_full_spec((B, num_classes)),
        out_shape=jax.ShapeDtypeStruct((B, num_classes), jnp.float32),
        compiler_params=pltpu.CompilerParams(
            dimension_semantics=("arbitrary",)),
    )(x, amap, pvec)


# ---------------------------------------------------------------------------
# Pure-JAX reference mirroring the PyTorch forward (for correctness check)
# ---------------------------------------------------------------------------
def _reference_forward(x_left, x_right, p):
    hi = lax.Precision.HIGHEST

    def bn(x, g, b, m, v):  # x: (B,C,H,W); params (1,C)
        g, b, m, v = (t[0][None, :, None, None] for t in (g, b, m, v))
        return (x - m) * lax.rsqrt(v + BN_EPS) * g + b

    def branch(x):
        B, C, H, W = x.shape
        xpad = jnp.pad(x, ((0, 0), (0, 0), (1, 1), (1, 1)))
        x_d = jnp.zeros_like(x)
        for dh in range(3):
            for dw in range(3):
                x_d = x_d + (p["kd"][dh, dw, :][None, :, None, None]
                             * xpad[:, :, dh:dh + H, dw:dw + W])
        x_d = bn(x_d + p["bd"][0][None, :, None, None],
                 p["gd"], p["bed"], p["md"], p["vd"])
        x_p = (jnp.einsum("bchw,cd->bdhw", x, p["wp"], precision=hi)
               + p["bp"][0][None, :, None, None])
        x_p = bn(x_p, p["gp"], p["bep"], p["mp"], p["vp"])
        w_att = jax.nn.sigmoid(x_d.mean((2, 3)) + x_p.mean((2, 3)))
        x_att = x * w_att[:, :, None, None]
        gap = x_att.mean((2, 3))
        h1 = jax.nn.relu(jnp.dot(gap, p["w1"], precision=hi) + p["b1"][0])
        y = jax.nn.sigmoid(jnp.dot(h1, p["w2"], precision=hi) + p["b2"][0])
        x_se = x_att * y[:, :, None, None]
        return x_se.mean((2, 3))

    feats = jnp.concatenate([branch(x_left), branch(x_right)], axis=1)
    return jnp.dot(feats, p["wc"], precision=hi) + p["bc"][0]


if __name__ == "__main__":
    B, C, H, W = 2, 32, 16, 16        # attention_channels=32 (reduction=16 -> Cr=2)
    NUM_CLASSES = 8

    key = jax.random.PRNGKey(0)
    k_xl, k_xr, k_p = jax.random.split(key, 3)
    x_left = jax.random.normal(k_xl, (B, C, H, W), jnp.float32)   # NCHW inputs
    x_right = jax.random.normal(k_xr, (B, C, H, W), jnp.float32)
    params = init_params(k_p, C, NUM_CLASSES)

    out = ncnv0_forward(x_left, x_right, params)
    jax.block_until_ready(out)
    assert out.shape == (B, NUM_CLASSES), out.shape

    ref = _reference_forward(x_left, x_right, params)
    max_err = float(jnp.max(jnp.abs(out - ref)))
    assert jnp.allclose(out, ref, rtol=5e-3, atol=5e-3), max_err

    print("KERNEL_OK")
</pallas_src>

<mosaic_0001>
module attributes {stable_mosaic.version = 11 : i64} {
  func.func @ncnv0_kernel(%arg0: i32, %arg1: memref<4x32x256xf32, #tpu.memory_space<vmem>>, %arg2: memref<32x256xf32, #tpu.memory_space<vmem>>, %arg3: memref<56x32xf32, #tpu.memory_space<vmem>>, %arg4: memref<2x8xf32, #tpu.memory_space<vmem>>) attributes {dimension_semantics = [#tpu.dimension_semantics<arbitrary>], iteration_bounds = array<i64: 1>, scalar_prefetch = 0 : i64, scratch_operands = 0 : i64, tpu.core_type = #tpu.core_type<tc>, window_params = [{pipeline_mode = #tpu.pipeline_mode<synchronous>, transform_indices = @transform_0, window_bounds = array<i64: 4, 32, 256>}, {pipeline_mode = #tpu.pipeline_mode<synchronous>, transform_indices = @transform_1, window_bounds = array<i64: 32, 256>}, {pipeline_mode = #tpu.pipeline_mode<synchronous>, transform_indices = @transform_2, window_bounds = array<i64: 56, 32>}, {pipeline_mode = #tpu.pipeline_mode<synchronous>, transform_indices = @transform_3, window_bounds = array<i64: 2, 8>}]} {
    %c0 = arith.constant 0 : index
    %c0_0 = arith.constant 0 : index
    %0 = vector.load %arg2[%c0, %c0_0] : memref<32x256xf32, #tpu.memory_space<vmem>>, vector<32x256xf32>
    %c0_1 = arith.constant 0 : index
    %c0_2 = arith.constant 0 : index
    %c0_3 = arith.constant 0 : index
    %1 = vector.load %arg1[%c0_1, %c0_2, %c0_3] : memref<4x32x256xf32, #tpu.memory_space<vmem>>, vector<4x32x256xf32>
    %cst = arith.constant dense<0.000000e+00> : vector<4x32xf32>
    %2 = vector.multi_reduction <add>, %1, %cst [2] : vector<4x32x256xf32> to vector<4x32xf32>
    %c0_4 = arith.constant 0 : index
    %c0_5 = arith.constant 0 : index
    %c0_6 = arith.constant 0 : index
    %3 = vector.load %arg1[%c0_4, %c0_5, %c0_6] : memref<4x32x256xf32, #tpu.memory_space<vmem>>, vector<4x32x256xf32>
    %4 = vector.shape_cast %0 : vector<32x256xf32> to vector<1x32x256xf32>
    %5 = vector.broadcast %4 : vector<1x32x256xf32> to vector<4x32x256xf32>
    %6 = arith.mulf %3, %5 : vector<4x32x256xf32>
    %cst_7 = arith.constant dense<0.000000e+00> : vector<4x32xf32>
    %7 = vector.multi_reduction <add>, %6, %cst_7 [2] : vector<4x32x256xf32> to vector<4x32xf32>
    %cst_8 = arith.constant 3.906250e-03 : f32
    %8 = vector.broadcast %cst_8 : f32 to vector<4x32xf32>
    %9 = arith.mulf %2, %8 : vector<4x32xf32>
    %c0_9 = arith.constant 0 : index
    %c0_10 = arith.constant 0 : index
    %10 = vector.load %arg3[%c0_9, %c0_10] : memref<56x32xf32, #tpu.memory_space<vmem>>, vector<32x32xf32>
    %c32 = arith.constant 32 : index
    %c0_11 = arith.constant 0 : index
    %11 = vector.load %arg3[%c32, %c0_11] : memref<56x32xf32, #tpu.memory_space<vmem>>, vector<2x32xf32>
    %c34 = arith.constant 34 : index
    %c0_12 = arith.constant 0 : index
    %12 = vector.load %arg3[%c34, %c0_12] : memref<56x32xf32, #tpu.memory_space<vmem>>, vector<2x32xf32>
    %c36 = arith.constant 36 : index
    %c0_13 = arith.constant 0 : index
    %13 = vector.load %arg3[%c36, %c0_13] : memref<56x32xf32, #tpu.memory_space<vmem>>, vector<1x32xf32>
    %c37 = arith.constant 37 : index
    %c0_14 = arith.constant 0 : index
    %14 = vector.load %arg3[%c37, %c0_14] : memref<56x32xf32, #tpu.memory_space<vmem>>, vector<1x32xf32>
    %c38 = arith.constant 38 : index
    %c0_15 = arith.constant 0 : index
    %15 = vector.load %arg3[%c38, %c0_15] : memref<56x32xf32, #tpu.memory_space<vmem>>, vector<1x2xf32>
    %c39 = arith.constant 39 : index
    %c0_16 = arith.constant 0 : index
    %16 = vector.load %arg3[%c39, %c0_16] : memref<56x32xf32, #tpu.memory_space<vmem>>, vector<1x8xf32>
    %c40 = arith.constant 40 : index
    %c0_17 = arith.constant 0 : index
    %17 = vector.load %arg3[%c40, %c0_17] : memref<56x32xf32, #tpu.memory_space<vmem>>, vector<8x32xf32>
    %c48 = arith.constant 48 : index
    %c0_18 = arith.constant 0 : index
    %18 = vector.load %arg3[%c48, %c0_18] : memref<56x32xf32, #tpu.memory_space<vmem>>, vector<8x32xf32>
    %cst_19 = arith.constant 3.906250e-03 : f32
    %19 = vector.broadcast %cst_19 : f32 to vector<4x32xf32>
    %20 = arith.mulf %7, %19 : vector<4x32xf32>
    %cst_20 = arith.constant dense<0.000000e+00> : vector<4x32xf32>
    %21 = tpu.matmul %9, %10, %cst_20 {dimension_numbers = #tpu.dot_dimension_numbers<[1], [0], [0], [1], [0, 0, 1, 1], [], []>} : vector<4x32xf32>, vector<32x32xf32>, vector<4x32xf32> -> vector<4x32xf32>
    %22 = arith.addf %20, %21 : vector<4x32xf32>
    %23 = vector.broadcast %13 : vector<1x32xf32> to vector<4x32xf32>
    %24 = arith.addf %22, %23 : vector<4x32xf32>
    %25 = arith.negf %24 : vector<4x32xf32>
    %26 = math.exp %25 : vector<4x32xf32>
    %cst_21 = arith.constant 1.000000e+00 : f32
    %27 = vector.broadcast %cst_21 : f32 to vector<4x32xf32>
    %28 = arith.addf %27, %26 : vector<4x32xf32>
    %29 = arith.divf %27, %28 : vector<4x32xf32>
    %30 = arith.mulf %9, %29 : vector<4x32xf32>
    %cst_22 = arith.constant dense<0.000000e+00> : vector<4x2xf32>
    %31 = tpu.matmul %30, %12, %cst_22 {dimension_numbers = #tpu.dot_dimension_numbers<[1], [1], [0], [0], [0, 0, 1, 0], [], []>} : vector<4x32xf32>, vector<2x32xf32>, vector<4x2xf32> -> vector<4x2xf32>
    %32 = vector.broadcast %15 : vector<1x2xf32> to vector<4x2xf32>
    %33 = arith.addf %31, %32 : vector<4x2xf32>
    %cst_23 = arith.constant 0.000000e+00 : f32
    %34 = vector.broadcast %cst_23 : f32 to vector<4x2xf32>
    %35 = arith.maximumf %33, %34 : vector<4x2xf32>
    %cst_24 = arith.constant dense<0.000000e+00> : vector<4x32xf32>
    %36 = tpu.matmul %35, %11, %cst_24 {dimension_numbers = #tpu.dot_dimension_numbers<[1], [0], [0], [1], [0, 0, 1, 1], [], []>} : vector<4x2xf32>, vector<2x32xf32>, vector<4x32xf32> -> vector<4x32xf32>
    %37 = vector.broadcast %14 : vector<1x32xf32> to vector<4x32xf32>
    %38 = arith.addf %36, %37 : vector<4x32xf32>
    %39 = arith.negf %38 : vector<4x32xf32>
    %40 = math.exp %39 : vector<4x32xf32>
    %cst_25 = arith.constant 1.000000e+00 : f32
    %41 = vector.broadcast %cst_25 : f32 to vector<4x32xf32>
    %42 = arith.addf %41, %40 : vector<4x32xf32>
    %43 = arith.divf %41, %42 : vector<4x32xf32>
    %44 = arith.mulf %30, %43 : vector<4x32xf32>
    %45 = vector.extract_strided_slice %44 {offsets = [0, 0], sizes = [2, 32], strides = [1, 1]} : vector<4x32xf32> to vector<2x32xf32>
    %cst_26 = arith.constant dense<0.000000e+00> : vector<2x8xf32>
    %46 = tpu.matmul %45, %17, %cst_26 {dimension_numbers = #tpu.dot_dimension_numbers<[1], [1], [0], [0], [0, 0, 1, 0], [], []>} : vector<2x32xf32>, vector<8x32xf32>, vector<2x8xf32> -> vector<2x8xf32>
    %47 = vector.extract_strided_slice %44 {offsets = [2, 0], sizes = [2, 32], strides = [1, 1]} : vector<4x32xf32> to vector<2x32xf32>
    %cst_27 = arith.constant dense<0.000000e+00> : vector<2x8xf32>
    %48 = tpu.matmul %47, %18, %cst_27 {dimension_numbers = #tpu.dot_dimension_numbers<[1], [1], [0], [0], [0, 0, 1, 0], [], []>} : vector<2x32xf32>, vector<8x32xf32>, vector<2x8xf32> -> vector<2x8xf32>
    %49 = arith.addf %46, %48 : vector<2x8xf32>
    %50 = vector.broadcast %16 : vector<1x8xf32> to vector<2x8xf32>
    %51 = arith.addf %49, %50 : vector<2x8xf32>
    %c0_28 = arith.constant 0 : index
    %c0_29 = arith.constant 0 : index
    %52 = vector.load %arg4[%c0_28, %c0_29] : memref<2x8xf32, #tpu.memory_space<vmem>>, vector<2x8xf32>
    tpu.vector_store %arg4[%c0_28, %c0_29], %51 {strides = array<i32>} : memref<2x8xf32, #tpu.memory_space<vmem>>, vector<2x8xf32>,
    return
  }
  func.func @transform_0(%arg0: i32) -> (i32, i32, i32) {
    %c0_i32 = arith.constant 0 : i32
    %c0_i32_0 = arith.constant 0 : i32
    %c0_i32_1 = arith.constant 0 : i32
    %c0_i32_2 = arith.constant 0 : i32
    return %c0_i32, %c0_i32_0, %c0_i32_1 : i32, i32, i32
  }
  func.func @transform_1(%arg0: i32) -> (i32, i32) {
    %c0_i32 = arith.constant 0 : i32
    %c0_i32_0 = arith.constant 0 : i32
    %c0_i32_1 = arith.constant 0 : i32
    return %c0_i32, %c0_i32_0 : i32, i32
  }
  func.func @transform_2(%arg0: i32) -> (i32, i32) {
    %c0_i32 = arith.constant 0 : i32
    %c0_i32_0 = arith.constant 0 : i32
    %c0_i32_1 = arith.constant 0 : i32
    return %c0_i32, %c0_i32_0 : i32, i32
  }
  func.func @transform_3(%arg0: i32) -> (i32, i32) {
    %c0_i32 = arith.constant 0 : i32
    %c0_i32_0 = arith.constant 0 : i32
    %c0_i32_1 = arith.constant 0 : i32
    return %c0_i32, %c0_i32_0 : i32, i32
  }
}

</mosaic_0001>

<bundles_post_ra>
// kernel: ncnv0_forward.1
= control target key start
LH: loop header
LB: loop body
LE: loop exit
PB: predicated region body
PF: predicated region fallthrough
CT: control target
= control target key end

     0   :  { %s2220_s0 = inlined_call_operand.vmem [shape: f32[4,32,256], index: 0, kind: input, shape index: {}]   ;;  %s2221_s1 = inlined_call_operand.vmem [shape: f32[32,256], index: 1, kind: input, shape index: {}]   ;;  %s2222_s2 = inlined_call_operand.vmem [shape: f32[56,32], index: 2, kind: input, shape index: {}]   ;;  %s2223_s3 = inlined_call_operand.hbm [shape: f32[2,8], index: 3, kind: output, shape index: {}]  }
   0x1   :  { %v1607_v0 = vld [vmem:[%s2220_s0 + $0x40] sm:$0xff]  ;;  %v1612_v1 = vld [vmem:[%s2220_s0 + $0x48] sm:$0xff]  ;;  %v1631_v6 = vld [vmem:[%s2220_s0 + $0x50] sm:$0xff] }
   0x2   :  { %v67_v2 = vadd.f32 %v1612_v1, %v1607_v0  ;;  %v1619_v3 = vld [vmem:[%s2220_s0] sm:$0xff]  ;;  %v1624_v4 = vld [vmem:[%s2220_s0 + $0x8] sm:$0xff]  ;;  %v1636_v7 = vld [vmem:[%s2220_s0 + $0x58] sm:$0xff] }
   0x3   :  { %v55_v5 = vadd.f32 %v1624_v4, %v1619_v3  ;;  %v1641_v8 = vld [vmem:[%s2220_s0 + $0x10] sm:$0xff]  ;;  %v70_v9 = vadd.f32 %v1636_v7, %v1631_v6  ;;  %v1648_v10 = vld [vmem:[%s2220_s0 + $0x18] sm:$0xff]  ;;  %v1655_v12 = vld [vmem:[%s2220_s0 + $0x60] sm:$0xff] }
   0x4   :  { %68 = vadd.xlane.f32.xlu1 %v67_v2  ;;  %v58_v11 = vadd.f32 %v1648_v10, %v1641_v8  ;;  %v1660_v13 = vld [vmem:[%s2220_s0 + $0x68] sm:$0xff]  ;;  %v1665_v14 = vld [vmem:[%s2220_s0 + $0x20] sm:$0xff]  ;;  %v1679_v18 = vld [vmem:[%s2220_s0 + $0x90] sm:$0xff] }
   0x5   :  { %56 = vadd.xlane.f32.xlu0 %v55_v5  ;;  %v1670_v15 = vld [vmem:[%s2220_s0 + $0x28] sm:$0xff]  ;;  %v73_v16 = vadd.f32 %v1660_v13, %v1655_v12  ;;  %v1684_v19 = vld [vmem:[%s2220_s0 + $0x98] sm:$0xff]  ;;  %v1689_v20 = vld [vmem:[%s2220_s0 + $0x80] sm:$0xff] }
   0x6   :  { %v61_v17 = vadd.f32 %v1670_v15, %v1665_v14  ;;  %v1694_v21 = vld [vmem:[%s2220_s0 + $0x88] sm:$0xff]  ;;  %v82_v22 = vadd.f32 %v1684_v19, %v1679_v18 }
   0x8   :  { %71 = vadd.xlane.f32.xlu1 %v70_v9 }
   0x9   :  { %59 = vadd.xlane.f32.xlu0 %v58_v11 }
   0xc   :  { %74 = vadd.xlane.f32.xlu1 %v73_v16 }
   0xd   :  { %8 = vsyncpa [#allocation3], 0  ;;  %62 = vadd.xlane.f32.xlu0 %v61_v17  ;;  %v79_v23 = vadd.f32 %v1694_v21, %v1689_v20  ;;  %v1703_v24 = vld [vmem:[%s2220_s0 + $0x70] sm:$0xff]  ;;  %v1708_v25 = vld [vmem:[%s2220_s0 + $0x78] sm:$0xff]  ;;  %v1579_v51 = vmov 0.0|0.0   ;;  %vm1580_vm0 = vmmov 0  }
   0xe   :  { %v1713_v26 = vld [vmem:[%s2220_s0 + $0x30] sm:$0xff]  ;;  %v1718_v27 = vld [vmem:[%s2220_s0 + $0x38] sm:$0xff]  ;;  %v76_v28 = vadd.f32 %v1708_v25, %v1703_v24  ;;  %v1727_v30 = vld [vmem:[%s2220_s0 + $0xc0] sm:$0xff]  ;;  %1474 = vmatprep.subr.bf16.mxu0 %v1579_v51  ;;  %v1581_v61 = vmov 0.0   ;;  %vm254_vm1 = vcmask 130112   ;;  %vm261_vm2 = vcmask 195712  }
   0xf   :  { %v64_v29 = vadd.f32 %v1718_v27, %v1713_v26  ;;  %v1732_v31 = vld [vmem:[%s2220_s0 + $0xc8] sm:$0xff]  ;;  %v1737_v32 = vld [vmem:[%s2220_s0 + $0xa0] sm:$0xff]  ;;  %v1751_v36 = vld [vmem:[%s2220_s0 + $0xb0] sm:$0xff]  ;;  %1451 = vmatprep.mubr.msk.f32.mxu0 %vm1580_vm0, %v1581_v61  ;;  %1454 = vmatprep.subr.mxu1 %v1581_v61  ;;  %vm268_vm3 = vcmask 261312   ;;  %vm327_vm4 = vcmask 1041409   ;;  %vm329_vm5 = vcmask 1042434  }
  0x10   :  { %83 = vadd.xlane.f32.xlu1 %v82_v22  ;;  %v1742_v33 = vld [vmem:[%s2220_s0 + $0xa8] sm:$0xff]  ;;  %v91_v34 = vadd.f32 %v1732_v31, %v1727_v30  ;;  %v1756_v37 = vld [vmem:[%s2220_s0 + $0xb8] sm:$0xff]  ;;  %v1761_v38 = vld [vmem:[%s2220_s0 + $0xd0] sm:$0xff]  ;;  %1456 = vmatprep.mubr.msk.f32.mxu1 %vm1580_vm0, %v1581_v61  ;;  %vm331_vm6 = vcmask 1043459   ;;  %vm333_vm7 = vcmask 261120   ;;  %vm898_vm8 = vcmask 1041408  }
  0x11   :  { %80 = vadd.xlane.f32.xlu0 %v79_v23  ;;  %v85_v35 = vadd.f32 %v1742_v33, %v1737_v32  ;;  %v1766_v39 = vld [vmem:[%s2220_s0 + $0xd8] sm:$0xff]  ;;  %v88_v40 = vadd.f32 %v1756_v37, %v1751_v36  ;;  %v1775_v42 = vld [vmem:[%s2220_s0 + $0xf0] sm:$0xff]  ;;  %v1785_v44 = vld [vmem:[%s2220_s0 + $0xe0] sm:$0xff]  ;;  %vm894_vm9 = vcmask 15360   ;;  %s1583_s5 = smov [#allocation2]   ;;  %vm1384_vm10 = vcmask 58368  }
  0x12   :  { %v94_v41 = vadd.f32 %v1766_v39, %v1761_v38  ;;  %v1780_v43 = vld [vmem:[%s2220_s0 + $0xf8] sm:$0xff]  ;;  %v1790_v45 = vld [vmem:[%s2220_s0 + $0xe8] sm:$0xff]  ;;  %v199_v48 = vld [vmem:[%s2222_s2] sm:$0xff]  ;;  %s1392_s6 = sshll.u32 %s1583_s5, 4  ;;  %s1393_s6 = int_to_ptr.vmem [resolvable:$true] %s1392_s6 }
  0x13   :  { %v100_v46 = vadd.f32 %v1780_v43, %v1775_v42  ;;  %v97_v47 = vadd.f32 %v1790_v45, %v1785_v44  ;;  %v200_v49 = vld [vmem:[%s2222_s2 + $0x8] sm:$0xff]  ;;  %v15_v52 = vld [vmem:[%s2221_s1] sm:$0xff]  ;;  %v201_v54 = vld [vmem:[%s2222_s2 + $0x10] sm:$0xff]  ;;  %s1555_s7 = scalar_lea.vmem %s1393_s6, 32  ;;  %p1560_p1 = scmp.lt.s32.totalorder %s1393_s6, %s1393_s6 }
  0x14   :  { %77 = vadd.xlane.f32.xlu1 %v76_v28  ;;  %v1475_v50 = vpack.c.bf16 %v200_v49, %v199_v48  ;;  %v16_v53 = vld [vmem:[%s2221_s1 + $0x8] sm:$0xff]  ;;  %v202_v55 = vld [vmem:[%s2222_s2 + $0x18] sm:$0xff]  ;;  %v103_v57 = vmul.f32 %v1619_v3, %v15_v52  ;;  %v111_v59 = vmul.f32 %v1607_v0, %v15_v52  ;;  %v17_v62 = vld [vmem:[%s2221_s1 + $0x10] sm:$0xff]  ;;  %v119_v23 = vmul.f32 %v1689_v20, %v15_v52  ;;  %p1556_p0 = scmp.ne.s32.totalorder %s1393_s6, %s1555_s7  ;;  %p1561_p2 = scmp.lt.s32.totalorder %s1555_s7, %s1555_s7 }
  0x15   :  { %65 = vadd.xlane.f32.xlu0 %v64_v29  ;;  %v1478_v56 = vpack.c.bf16 %v202_v55, %v201_v54  ;;  %v104_v58 = vmul.f32 %v1624_v4, %v16_v53  ;;  %v112_v60 = vmul.f32 %v1612_v1, %v16_v53  ;;  %v18_v63 = vld [vmem:[%s2221_s1 + $0x18] sm:$0xff]  ;;  %v105_v1 = vmul.f32 %v1641_v8, %v17_v62  ;;  %v19_v5 = vld [vmem:[%s2221_s1 + $0x20] sm:$0xff]  ;;  %v20_v9 = vld [vmem:[%s2221_s1 + $0x28] sm:$0xff] }
  0x16   :  { %1476 = vmatpush3.bf16.msra.mxu0 %v1475_v50  ;;  %v106_v2 = vmul.f32 %v1648_v10, %v18_v63  ;;  %v113_v3 = vmul.f32 %v1631_v6, %v17_v62  ;;  %v114_v4 = vmul.f32 %v1636_v7, %v18_v63  ;;  %v107_v17 = vmul.f32 %v1665_v14, %v19_v5  ;;  %p1562_p3 = por %p1561_p2, %p1560_p1 }
  0x17   :  { %1477 = vmatprep.subr.bf16.mxu0 %v1579_v51  ;;  %v135_v0 = vadd.f32 %v104_v58, %v103_v57  ;;  %v147_v11 = vadd.f32 %v112_v60, %v111_v59  ;;  %v108_v8 = vmul.f32 %v1670_v15, %v20_v9  ;;  %v115_v6 = vmul.f32 %v1655_v12, %v19_v5  ;;  %v21_v15 = vld [vmem:[%s2221_s1 + $0x30] sm:$0xff]  ;;  %v22_v12 = vld [vmem:[%s2221_s1 + $0x38] sm:$0xff] }
  0x18   :  { %92 = vadd.xlane.f32.xlu1 %v91_v34  ;;  %v138_v16 = vadd.f32 %v106_v2, %v105_v1  ;;  %v150_v10 = vadd.f32 %v114_v4, %v113_v3  ;;  %v116_v7 = vmul.f32 %v1660_v13, %v20_v9  ;;  %v120_v28 = vmul.f32 %v1694_v21, %v16_v53  ;;  %p1563_p4 = pnand %p1562_p3, %p1556_p0 }
  0x19   :  { %86 = vadd.xlane.f32.xlu0 %v85_v35  ;;  %v141_v22 = vadd.f32 %v108_v8, %v107_v17  ;;  %v121_v34 = vmul.f32 %v1679_v18, %v17_v62  ;;  %v122_v14 = vmul.f32 %v1684_v19, %v18_v63  ;;  %v109_v20 = vmul.f32 %v1713_v26, %v21_v15 }
  0x1a   :  { %1479 = vmatpush3.bf16.msra.mxu0 %v1478_v56  ;;  %v153_v29 = vadd.f32 %v116_v7, %v115_v6  ;;  %v159_v13 = vadd.f32 %v120_v28, %v119_v23  ;;  %v110_v21 = vmul.f32 %v1718_v27, %v22_v12  ;;  %v117_v18 = vmul.f32 %v1703_v24, %v21_v15 }
  0x1b   :  { %1464 = vmatprep.subr.mxu0 %v1581_v61  ;;  %v162_v35 = vadd.f32 %v122_v14, %v121_v34  ;;  %v118_v19 = vmul.f32 %v1708_v25, %v22_v12  ;;  %v127_v48 = vmul.f32 %v1727_v30, %v15_v52  ;;  %v128_v26 = vmul.f32 %v1732_v31, %v16_v53 }
  0x1c   :  { %89 = vadd.xlane.f32.xlu1 %v88_v40  ;;  %v144_v40 = vadd.f32 %v110_v21, %v109_v20  ;;  %v129_v49 = vmul.f32 %v1761_v38, %v17_v62  ;;  %v130_v24 = vmul.f32 %v1766_v39, %v18_v63  ;;  %v125_v50 = vmul.f32 %v1751_v36, %v21_v15  ;;  %v1873_v36 = vld [vmem:[%s2222_s2 + $0x24] ss:$0 sm:$0xff] }
  0x1d   :  { %95 = vadd.xlane.f32.xlu0 %v94_v41  ;;  %v123_v41 = vmul.f32 %v1737_v32, %v19_v5  ;;  %v171_v25 = vadd.f32 %v128_v26, %v127_v48  ;;  %v126_v32 = vmul.f32 %v1756_v37, %v22_v12  ;;  %v131_v51 = vmul.f32 %v1785_v44, %v19_v5 }
  0x1e   :  { %v132_v30 = vmul.f32 %v1790_v45, %v20_v9  ;;  %v133_v52 = vmul.f32 %v1775_v42, %v21_v15  ;;  %v134_v38 = vmul.f32 %v1780_v43, %v22_v12  ;;  %v243_v55 = vlaneseq }
  0x1f   :  { %v168_v31 = vadd.f32 %v126_v32, %v125_v50 }
  0x20   :  { %101 = vadd.xlane.f32.xlu1 %v100_v46  ;;  %v124_v46 = vmul.f32 %v1742_v33, %v20_v9  ;;  %v174_v33 = vadd.f32 %v130_v24, %v129_v49  ;;  %v177_v39 = vadd.f32 %v132_v30, %v131_v51  ;;  %v180_v53 = vadd.f32 %v134_v38, %v133_v52 }
  0x21   :  { %98 = vadd.xlane.f32.xlu0 %v97_v47  ;;  %v156_v47 = vadd.f32 %v118_v19, %v117_v18  ;;  %v244_v58 = vand.u32 127, %v243_v55  ;;  %v1878_v59 = vshrl.u32 %v243_v55, 7 }
  0x22   :  { %v165_v27 = vadd.f32 %v124_v46, %v123_v41 }
  0x23   :  { %v249_v60 = vadd.s32 4294967288, %v244_v58  ;;  %v256_v63 = vadd.s32 4294967280, %v244_v58  ;;  %v263_v1 = vadd.s32 4294967272, %v244_v58  ;;  %v1881_v2 = vsub.s32 %v244_v58, %v1878_v59 }
  0x24   :  { %139 = vadd.xlane.f32.xlu1 %v138_v16 }
  0x25   :  { %136 = vadd.xlane.f32.xlu0 %v135_v0  ;;  %v1886_v4 = vsub.s32 %v249_v60, %v1878_v59  ;;  %v1893_v16 = vsub.s32 %v256_v63, %v1878_v59 }
  0x28   :  { %151 = vadd.xlane.f32.xlu1 %v150_v10 }
  0x29   :  { %148 = vadd.xlane.f32.xlu0 %v147_v11 }
  0x2c   :  { %154 = vadd.xlane.f32.xlu1 %v153_v29 }
  0x2d   :  { %142 = vadd.xlane.f32.xlu0 %v141_v22  ;;  %v1904_v22 = vsub.s32 %v263_v1, %v1878_v59  ;;  %v428_v1 = vsub.s32 1, %v1878_v59 }
  0x30   :  { %163 = vadd.xlane.f32.xlu1 %v162_v35 }
  0x31   :  { %160 = vadd.xlane.f32.xlu0 %v159_v13 }
  0x34   :  { %157 = vadd.xlane.f32.xlu1 %v156_v47 }
  0x35   :  { %145 = vadd.xlane.f32.xlu0 %v144_v40 }
  0x38   :  { %172 = vadd.xlane.f32.xlu1 %v171_v25 }
  0x39   :  { %166 = vadd.xlane.f32.xlu0 %v165_v27 }
  0x3c   :  { %169 = vadd.xlane.f32.xlu1 %v168_v31 }
  0x3d   :  { %175 = vadd.xlane.f32.xlu0 %v174_v33 }
  0x40   :  { %181 = vadd.xlane.f32.xlu1 %v180_v53 }
  0x41   :  { %178 = vadd.xlane.f32.xlu0 %v177_v39 }
  0x51   :  { %521 = vbcast.lane.b32.xlu1 %v1873_v36, 256 }
  0x55   :  { %529 = vbcast.lane.b32.xlu1 %v1873_v36, 272 }
  0x57   :  { %525 = vbcast.lane.b32.xlu0 %v1873_v36, 264 }
  0x91   :  { %v69_v37 = vpop.xlane.xlu1 %68 }
  0x92   :  { %v57_v42 = vpop.xlane.xlu0 %56  ;;  %v1883_v3 = vmul.f32 0.00390625, %v69_v37 }
  0x93   :  { %v1908_v28 = vmul.f32 0.00390625, %v57_v42 }
  0x94   :  { %v273_v14 = vrot.slane %v1883_v3, %v1881_v2 }
  0x95   :  { %v72_v43 = vpop.xlane.xlu1 %71  ;;  %v248_v47 = vrot.slane %v1908_v28, %v1881_v2 }
  0x96   :  { %v60_v44 = vpop.xlane.xlu0 %59  ;;  %v1888_v5 = vmul.f32 0.00390625, %v72_v43 }
  0x97   :  { %v1890_v11 = vmul.f32 0.00390625, %v60_v44 }
  0x98   :  { %v277_v15 = vrot.slane %v1888_v5, %v1886_v4 }
  0x99   :  { %v75_v45 = vpop.xlane.xlu1 %74  ;;  %v253_v13 = vrot.slane %v1890_v11, %v1886_v4 }
  0x9a   :  { %v63_v54 = vpop.xlane.xlu0 %62  ;;  %v1895_v17 = vmul.f32 0.00390625, %v75_v45  ;;  %v278_v49 = vsel %vm254_vm1, %v277_v15, %v273_v14  ;;  %v447_v14 = vsub.s32 2, %v1878_v59 }
  0x9b   :  { %v1897_v8 = vmul.f32 0.00390625, %v63_v54  ;;  %v255_v50 = vsel %vm254_vm1, %v253_v13, %v248_v47 }
  0x9c   :  { %v282_v20 = vrot.slane %v1895_v17, %v1893_v16 }
  0x9d   :  { %v84_v56 = vpop.xlane.xlu1 %83  ;;  %v260_v21 = vrot.slane %v1897_v8, %v1893_v16 }
  0x9e   :  { %v81_v57 = vpop.xlane.xlu0 %80  ;;  %v1899_v6 = vmul.f32 0.00390625, %v84_v56  ;;  %v283_v32 = vsel %vm261_vm2, %v282_v20, %v278_v49  ;;  %v1582_v20 = vmov 0  }
  0x9f   :  { %v1901_v7 = vmul.f32 0.00390625, %v81_v57  ;;  %v262_v31 = vsel %vm261_vm2, %v260_v21, %v255_v50  ;;  %1486 = vset.pattern.permute.xlu1 %v1582_v20  ;;  %1485 = vset.pattern.permute.xlu0 %v1582_v20 }
  0xa0   :  { %v296_v19 = vrot.slane %v1899_v6, %v1886_v4 }
  0xa1   :  { %v78_v62 = vpop.xlane.xlu1 %77  ;;  %v292_v40 = vrot.slane %v1901_v7, %v1881_v2 }
  0xa2   :  { %v66_v0 = vpop.xlane.xlu0 %65  ;;  %v1906_v23 = vmul.f32 0.00390625, %v78_v62  ;;  %v409_v62 = vsub.s32 0, %v1878_v59 }
  0xa3   :  { %v1910_v29 = vmul.f32 0.00390625, %v66_v0  ;;  %v297_v52 = vsel %vm254_vm1, %v296_v19, %v292_v40 }
  0xa4   :  { %v287_v41 = vrot.slane %v1906_v23, %v1904_v22 }
  0xa5   :  { %v93_v9 = vpop.xlane.xlu1 %92  ;;  %v267_v48 = vrot.slane %v1910_v29, %v1904_v22 }
  0xa6   :  { %v87_v10 = vpop.xlane.xlu0 %86  ;;  %v1938_v26 = vmul.f32 0.00390625, %v93_v9  ;;  %v288_v38 = vsel %vm268_vm3, %v287_v41, %v283_v32 }
  0xa7   :  { %v1912_v34 = vmul.f32 0.00390625, %v87_v10  ;;  %v269_v53 = vsel %vm268_vm3, %v267_v48, %v262_v31 }
  0xa8   :  { %v311_v37 = vrot.slane %v1938_v26, %v1881_v2  ;;  %v328_v56 = vsel %vm327_vm4, %v288_v38, %v269_v53 }
  0xa9   :  { %v90_v12 = vpop.xlane.xlu1 %89  ;;  %v301_v27 = vrot.slane %v1912_v34, %v1893_v16 }
  0xaa   :  { %v1924_v35 = vmul.f32 0.00390625, %v90_v12  ;;  %v96_v18 = vpop.xlane.xlu0 %95  ;;  %v466_v12 = vsub.s32 3, %v1878_v59 }
  0xab   :  { %v1932_v46 = vmul.f32 0.00390625, %v96_v18  ;;  %v302_v42 = vsel %vm261_vm2, %v301_v27, %v297_v52 }
  0xac   :  { %v306_v24 = vrot.slane %v1924_v35, %v1904_v22 }
  0xad   :  { %v102_v25 = vpop.xlane.xlu1 %101  ;;  %v315_v33 = vrot.slane %v1932_v46, %v1886_v4 }
  0xae   :  { %v99_v51 = vpop.xlane.xlu0 %98  ;;  %v1949_v30 = vmul.f32 0.00390625, %v102_v25  ;;  %v307_v44 = vsel %vm268_vm3, %v306_v24, %v302_v42 }
  0xaf   :  { %v1954_v39 = vmul.f32 0.00390625, %v99_v51  ;;  %v316_v54 = vsel %vm254_vm1, %v315_v33, %v311_v37  ;;  %v330_v58 = vsel %vm329_vm5, %v307_v44, %v328_v56 }
  0xb0   :  { %v325_v43 = vrot.slane %v1949_v30, %v1904_v22 }
  0xb1   :  { %v320_v45 = vrot.slane %v1954_v39, %v1893_v16  ;;  %v140_v21 = vpop.xlane.xlu1 %139 }
  0xb2   :  { %v137_v19 = vpop.xlane.xlu0 %136  ;;  %v212_v53 = vmul.f32 0.00390625, %v140_v21 }
  0xb3   :  { %v321_v55 = vsel %vm261_vm2, %v320_v45, %v316_v54  ;;  %v211_v37 = vmul.f32 0.00390625, %v137_v19 }
  0xb4   :  { %v326_v57 = vsel %vm268_vm3, %v325_v43, %v321_v55 }
  0xb5   :  { %v332_v60 = vsel %vm331_vm6, %v326_v57, %v330_v58  ;;  %v152_v18 = vpop.xlane.xlu1 %151 }
  0xb6   :  { %1452 = vmatmul.mubr.msk.f32.vlgmr.msra.gmra.mrb[0].mxu0 %vm333_vm7, %v332_v60  ;;  %v149_v41 = vpop.xlane.xlu0 %148 }
  0xb7   :  { %1466 = vmatprep.mubr.msk.f32.mxu0 %vm1580_vm0, %v1581_v61  ;;  %v215_v54 = vmul.f32 0.00390625, %v149_v41 }
  0xb9   :  { %v155_v40 = vpop.xlane.xlu1 %154 }
  0xba   :  { %v143_v48 = vpop.xlane.xlu0 %142 }
  0xbb   :  { %v213_v55 = vmul.f32 0.00390625, %v143_v48 }
  0xbd   :  { %v164_v47 = vpop.xlane.xlu1 %163 }
  0xbe   :  { %v161_v49 = vpop.xlane.xlu0 %160 }
  0xc1   :  { %v1987_v27 = vpop.xlane.xlu1 %157 }
  0xc2   :  { %v1991_v25 = vpop.xlane.xlu0 %145 }
  0xc5   :  { %v1989_v24 = vpop.xlane.xlu1 %172 }
  0xc6   :  { %v167_v32 = vpop.xlane.xlu0 %166 }
  0xc9   :  { %v1993_v50 = vpop.xlane.xlu1 %169 }
  0xcd   :  { %v1995_v33 = vpop.xlane.xlu1 %181 }
  0xd1   :  { %v1999_v51 = vpop.permute.xlu1 %521 }
  0xd5   :  { %v2003_v52 = vpop.permute.xlu1 %529 }
 0x189   :  { %v402_v63 = vpop.f32.mrb[0].mxu0 }
 0x18a   :  { %v410_v0 = vrot.slane %v402_v63, %v409_v62  ;;  %v1453_v9 = vpop.f32.mrb[1].mxu0  ;;  %v429_v10 = vrot.slane %v402_v63, %v428_v1  ;;  %v448_v15 = vrot.slane %v402_v63, %v447_v14  ;;  %v467_v13 = vrot.slane %v402_v63, %v466_v12 }
 0x18c   :  { %416 = vbcast.lane.b32.xlu1 %v410_v0, 264  ;;  %412 = vbcast.lane.b32.xlu0 %v410_v0, 256 }
 0x190   :  { %431 = vbcast.lane.b32.xlu1 %v429_v10, 256  ;;  %420 = vbcast.lane.b32.xlu0 %v410_v0, 272 }
 0x194   :  { %435 = vbcast.lane.b32.xlu1 %v429_v10, 264  ;;  %450 = vbcast.lane.b32.xlu0 %v448_v15, 256 }
 0x198   :  { %439 = vbcast.lane.b32.xlu1 %v429_v10, 272  ;;  %424 = vbcast.lane.b32.xlu0 %v410_v0, 280 }
 0x19c   :  { %454 = vbcast.lane.b32.xlu1 %v448_v15, 264  ;;  %458 = vbcast.lane.b32.xlu0 %v448_v15, 272 }
 0x1a0   :  { %443 = vbcast.lane.b32.xlu1 %v429_v10, 280  ;;  %473 = vbcast.lane.b32.xlu0 %v467_v13, 264 }
 0x1a4   :  { %469 = vbcast.lane.b32.xlu1 %v467_v13, 256  ;;  %477 = vbcast.lane.b32.xlu0 %v467_v13, 272 }
 0x1a8   :  { %462 = vbcast.lane.b32.xlu1 %v448_v15, 280  ;;  %481 = vbcast.lane.b32.xlu0 %v467_v13, 280  ;;  %v216_v15 = vmul.f32 0.00390625, %v152_v18  ;;  %v219_v13 = vmul.f32 0.00390625, %v161_v49 }
 0x1ac   :  { %533 = vbcast.lane.b32.xlu1 %v1873_v36, 280  ;;  %v1997_v36 = vpop.xlane.xlu0 %175 }
 0x1b0   :  { %v2001_v31 = vpop.xlane.xlu0 %178 }
 0x1b4   :  { %v2005_v38 = vpop.permute.xlu0 %525 }
 0x1fe   :  { %v417_v42 = vpop.permute.xlu1 %416  ;;  %v413_v43 = vpop.permute.xlu0 %412 }
 0x1ff   :  { %v500_v44 = vadd.f32 %v417_v42, %v212_v53  ;;  %v499_v45 = vadd.f32 %v413_v43, %v211_v37  ;;  %v217_v43 = vmul.f32 0.00390625, %v155_v40 }
 0x201   :  { %v540_v56 = vadd.f32 %v2005_v38, %v500_v44  ;;  %v539_v57 = vadd.f32 %v1999_v51, %v499_v45 }
 0x202   :  { %v432_v58 = vpop.permute.xlu1 %431  ;;  %v421_v60 = vpop.permute.xlu0 %420 }
 0x203   :  { %v1403_v63 = vmul.f32 -1.442695, %v540_v56  ;;  %v1402_v0 = vmul.f32 -1.442695, %v539_v57  ;;  %v503_v9 = vadd.f32 %v432_v58, %v215_v54  ;;  %v501_v10 = vadd.f32 %v421_v60, %v213_v55 }
 0x204   :  { %v220_v57 = vmul.f32 0.00390625, %v164_v47 }
 0x205   :  { %1487 = vpow2.f32 %v1403_v63  ;;  %v543_v20 = vadd.f32 %v1999_v51, %v503_v9  ;;  %v541_v21 = vadd.f32 %v2003_v52, %v501_v10 }
 0x206   :  { %1489 = vpow2.f32 %v1402_v0  ;;  %v436_v19 = vpop.permute.xlu1 %435  ;;  %v451_v41 = vpop.permute.xlu0 %450 }
 0x207   :  { %v1406_v48 = vmul.f32 -1.442695, %v543_v20  ;;  %v1404_v53 = vmul.f32 -1.442695, %v541_v21  ;;  %v504_v37 = vadd.f32 %v436_v19, %v216_v15  ;;  %v507_v42 = vadd.f32 %v451_v41, %v219_v13 }
 0x208   :  { %v221_v13 = vmul.f32 0.00390625, %v167_v32 }
 0x209   :  { %1491 = vpow2.f32 %v1406_v48  ;;  %v544_v44 = vadd.f32 %v2005_v38, %v504_v37  ;;  %v547_v45 = vadd.f32 %v1999_v51, %v507_v42 }
 0x20a   :  { %1493 = vpow2.f32 %v1404_v53  ;;  %v440_v18 = vpop.permute.xlu1 %439  ;;  %v425_v49 = vpop.permute.xlu0 %424 }
 0x20b   :  { %v1407_v54 = vmul.f32 -1.442695, %v544_v44  ;;  %v1410_v55 = vmul.f32 -1.442695, %v547_v45  ;;  %v505_v56 = vadd.f32 %v440_v18, %v217_v43  ;;  %v223_v43 = vmul.f32 0.00390625, %v1989_v24 }
 0x20c   :  { %v224_v45 = vmul.f32 0.00390625, %v1997_v36 }
 0x20d   :  { %1495 = vpow2.f32 %v1407_v54  ;;  %v545_v58 = vadd.f32 %v2003_v52, %v505_v56 }
 0x20e   :  { %1497 = vpow2.f32 %v1410_v55  ;;  %v455_v60 = vpop.permute.xlu1 %454  ;;  %v459_v63 = vpop.permute.xlu0 %458 }
 0x20f   :  { %v1488_v0 = vpop.eup %1487  ;;  %v1408_v40 = vmul.f32 -1.442695, %v545_v58  ;;  %v508_v9 = vadd.f32 %v455_v60, %v220_v57  ;;  %v509_v53 = vadd.f32 %v459_v63, %v221_v13  ;;  %v214_v63 = vmul.f32 0.00390625, %v1991_v25 }
 0x210   :  { %v1490_v10 = vpop.eup %1489  ;;  %v604_v15 = vadd.f32 1.0, %v1488_v0 }
 0x211   :  { %v603_v20 = vadd.f32 1.0, %v1490_v10  ;;  %1499 = vpow2.f32 %v1408_v40  ;;  %v548_v21 = vadd.f32 %v2005_v38, %v508_v9  ;;  %v549_v54 = vadd.f32 %v2003_v52, %v509_v53 }
 0x212   :  { %1501 = vrcp.f32 %v604_v15  ;;  %v444_v19 = vpop.permute.xlu1 %443  ;;  %v474_v41 = vpop.permute.xlu0 %473  ;;  %v225_v40 = vmul.f32 0.00390625, %v2001_v31  ;;  %v218_v10 = vmul.f32 0.00390625, %v1987_v27  ;;  %v222_v15 = vmul.f32 0.00390625, %v1993_v50 }
 0x213   :  { %v1492_v47 = vpop.eup %1491  ;;  %1503 = vrcp.f32 %v603_v20  ;;  %v1411_v48 = vmul.f32 -1.442695, %v548_v21  ;;  %v512_v60 = vadd.f32 %v474_v41, %v224_v45  ;;  %v502_v13 = vadd.f32 %v425_v49, %v214_v63 }
 0x214   :  { %v1494_v37 = vpop.eup %1493  ;;  %v607_v42 = vadd.f32 1.0, %v1492_v47  ;;  %v1412_v20 = vmul.f32 -1.442695, %v549_v54  ;;  %v506_v53 = vadd.f32 %v444_v19, %v218_v10  ;;  %v226_v27 = vmul.f32 0.00390625, %v1995_v33 }
 0x215   :  { %v605_v44 = vadd.f32 1.0, %v1494_v37  ;;  %1505 = vpow2.f32 %v1411_v48  ;;  %v552_v41 = vadd.f32 %v2005_v38, %v512_v60 }
 0x216   :  { %1507 = vrcp.f32 %v607_v42  ;;  %v470_v32 = vpop.permute.xlu1 %469  ;;  %v478_v56 = vpop.permute.xlu0 %477 }
 0x217   :  { %v1496_v18 = vpop.eup %1495  ;;  %v511_v55 = vadd.f32 %v470_v32, %v223_v43  ;;  %1509 = vrcp.f32 %v605_v44  ;;  %v513_v25 = vadd.f32 %v478_v56, %v225_v40 }
 0x218   :  { %v1498_v57 = vpop.eup %1497  ;;  %v608_v58 = vadd.f32 1.0, %v1496_v18  ;;  %v1415_v18 = vmul.f32 -1.442695, %v552_v41 }
 0x219   :  { %v611_v0 = vadd.f32 1.0, %v1498_v57  ;;  %v551_v24 = vadd.f32 %v1999_v51, %v511_v55 }
 0x21a   :  { %1511 = vrcp.f32 %v608_v58  ;;  %v463_v36 = vpop.permute.xlu1 %462  ;;  %v482_v31 = vpop.permute.xlu0 %481 }
 0x21b   :  { %v1500_v9 = vpop.eup %1499  ;;  %1513 = vrcp.f32 %v611_v0  ;;  %v1414_v51 = vmul.f32 -1.442695, %v551_v24  ;;  %v510_v37 = vadd.f32 %v463_v36, %v222_v15  ;;  %v514_v54 = vadd.f32 %v482_v31, %v226_v27 }
 0x21c   :  { %v1502_v21 = vpop.eup %1501  ;;  %v609_v47 = vadd.f32 1.0, %v1500_v9 }
 0x21d   :  { %v1504_v48 = vpop.eup %1503  ;;  %v2025_v42 = vmul.f32 %v1502_v21, %v1890_v11  ;;  %v553_v11 = vadd.f32 %v2003_v52, %v513_v25 }
 0x21e   :  { %1515 = vrcp.f32 %v609_v47  ;;  %v534_v50 = vpop.permute.xlu1 %533  ;;  %v2029_v49 = vmul.f32 %v1504_v48, %v1908_v28 }
 0x21f   :  { %v1506_v43 = vpop.eup %1505  ;;  %1517 = vpow2.f32 %v1412_v20  ;;  %v542_v44 = vadd.f32 %v534_v50, %v502_v13  ;;  %v546_v38 = vadd.f32 %v534_v50, %v506_v53  ;;  %v550_v45 = vadd.f32 %v534_v50, %v510_v37  ;;  %691 = vperm.xlu1 %1486, %v2025_v42  }
 0x220   :  { %v1508_v19 = vpop.eup %1507  ;;  %v612_v32 = vadd.f32 1.0, %v1506_v43  ;;  %688 = vperm.xlu0 %1485, %v2029_v49   ;;  %1519 = vpow2.f32 %v1414_v51  ;;  %v554_v57 = vadd.f32 %v534_v50, %v514_v54  ;;  %v1416_v52 = vmul.f32 -1.442695, %v553_v11 }
 0x221   :  { %v1405_v33 = vmul.f32 -1.442695, %v542_v44  ;;  %v1409_v55 = vmul.f32 -1.442695, %v546_v38  ;;  %v2035_v28 = vmul.f32 %v1508_v19, %v1883_v3  ;;  %v1510_v56 = vpop.eup %1509  ;;  %v1413_v58 = vmul.f32 -1.442695, %v550_v45 }
 0x222   :  { %1521 = vrcp.f32 %v612_v32  ;;  %v2042_v0 = vmul.f32 %v1510_v56, %v1897_v8  ;;  %v1417_v3 = vmul.f32 -1.442695, %v554_v57 }
 0x223   :  { %1523 = vpow2.f32 %v1405_v33  ;;  %700 = vperm.xlu1 %1486, %v2035_v28  }
 0x224   :  { %v1512_v60 = vpop.eup %1511  ;;  %1525 = vpow2.f32 %v1409_v55 }
 0x225   :  { %1527 = vpow2.f32 %v1415_v18  ;;  %v2039_v63 = vmul.f32 %v1512_v60, %v1888_v5  ;;  %v1514_v24 = vpop.eup %1513 }
 0x226   :  { %1529 = vpow2.f32 %v1413_v58  ;;  %v2050_v10 = vmul.f32 %v1514_v24, %v1901_v7 }
 0x227   :  { %703 = vperm.xlu0 %1485, %v2039_v63   ;;  %694 = vperm.xlu1 %1486, %v2042_v0   ;;  %1531 = vpow2.f32 %v1416_v52 }
 0x228   :  { %v1516_v40 = vpop.eup %1515  ;;  %1533 = vpow2.f32 %v1417_v3 }
 0x229   :  { %v1518_v36 = vpop.eup %1517  ;;  %v2047_v9 = vmul.f32 %v1516_v40, %v1895_v17 }
 0x22a   :  { %v1520_v5 = vpop.eup %1519  ;;  %v613_v21 = vadd.f32 1.0, %v1518_v36 }
 0x22b   :  { %706 = vperm.xlu0 %1485, %v2047_v9   ;;  %712 = vperm.xlu1 %1486, %v2050_v10   ;;  %v615_v17 = vadd.f32 1.0, %v1520_v5 }
 0x22c   :  { %v1522_v8 = vpop.eup %1521 }
 0x22d   :  { %v1524_v15 = vpop.eup %1523  ;;  %v2055_v13 = vmul.f32 %v1522_v8, %v1899_v6 }
 0x22e   :  { %v1526_v20 = vpop.eup %1525  ;;  %v606_v47 = vadd.f32 1.0, %v1524_v15 }
 0x22f   :  { %v1528_v41 = vpop.eup %1527  ;;  %v610_v25 = vadd.f32 1.0, %v1526_v20  ;;  %715 = vperm.xlu0 %1485, %v2055_v13  }
 0x230   :  { %v1530_v7 = vpop.eup %1529  ;;  %1535 = vrcp.f32 %v606_v47  ;;  %v616_v48 = vadd.f32 1.0, %v1528_v41 }
 0x231   :  { %1537 = vrcp.f32 %v610_v25  ;;  %v1532_v53 = vpop.eup %1531  ;;  %v614_v51 = vadd.f32 1.0, %v1530_v7 }
 0x232   :  { %1539 = vrcp.f32 %v613_v21  ;;  %v1534_v37 = vpop.eup %1533  ;;  %v617_v6 = vadd.f32 1.0, %v1532_v53 }
 0x233   :  { %1541 = vrcp.f32 %v615_v17  ;;  %v618_v31 = vadd.f32 1.0, %v1534_v37 }
 0x234   :  { %1543 = vrcp.f32 %v616_v48 }
 0x235   :  { %1545 = vrcp.f32 %v614_v51 }
 0x236   :  { %1547 = vrcp.f32 %v617_v6 }
 0x237   :  { %1549 = vrcp.f32 %v618_v31 }
 0x23a   :  { %v1536_v27 = vpop.eup %1535 }
 0x23b   :  { %v1538_v50 = vpop.eup %1537  ;;  %v2059_v43 = vmul.f32 %v1536_v27, %v1910_v29 }
 0x23c   :  { %v1540_v44 = vpop.eup %1539  ;;  %v2062_v38 = vmul.f32 %v1538_v50, %v1906_v23 }
 0x23d   :  { %v1542_v45 = vpop.eup %1541  ;;  %697 = vperm.xlu1 %1486, %v2059_v43   ;;  %v2067_v19 = vmul.f32 %v1540_v44, %v1912_v34 }
 0x23e   :  { %709 = vperm.xlu0 %1485, %v2062_v38   ;;  %v1544_v32 = vpop.eup %1543  ;;  %v2070_v18 = vmul.f32 %v1542_v45, %v1938_v26 }
 0x23f   :  { %v1546_v11 = vpop.eup %1545  ;;  %v2075_v23 = vmul.f32 %v1544_v32, %v1932_v46 }
 0x240   :  { %v1548_v29 = vpop.eup %1547  ;;  %v2078_v54 = vmul.f32 %v1546_v11, %v1924_v35  ;;  %v204_v35 = vld [vmem:[%s2222_s2 + $0x22] sm:$0x3] }
 0x241   :  { %718 = vperm.xlu1 %1486, %v2067_v19   ;;  %v1550_v33 = vpop.eup %1549  ;;  %v2083_v34 = vmul.f32 %v1548_v29, %v1954_v39  ;;  %1455 = vmatpush3.xpose.msk.msra.mxu1 %vm333_vm7, %v204_v35 }
 0x242   :  { %724 = vperm.xlu0 %1485, %v2070_v18   ;;  %v2086_v26 = vmul.f32 %v1550_v33, %v1949_v30  ;;  %1459 = vmatprep.subr.mxu1 %v1581_v61 }
 0x245   :  { %727 = vperm.xlu1 %1486, %v2075_v23  }
 0x246   :  { %721 = vperm.xlu0 %1485, %v2078_v54  }
 0x249   :  { %730 = vperm.xlu1 %1486, %v2083_v34  }
 0x24a   :  { %733 = vperm.xlu0 %1485, %v2086_v26  }
 0x29e   :  { %v692_v46 = vpop.permute.xlu1 %691 }
 0x29f   :  { %v689_v55 = vpop.permute.xlu0 %688  ;;  %v742_v36 = vrot.slane %v692_v46, %v1886_v4 }
 0x2a0   :  { %v738_v5 = vrot.slane %v689_v55, %v1881_v2 }
 0x2a2   :  { %v701_v56 = vpop.permute.xlu1 %700  ;;  %v743_v51 = vsel %vm254_vm1, %v742_v36, %v738_v5 }
 0x2a3   :  { %v757_v47 = vrot.slane %v701_v56, %v1881_v2 }
 0x2a6   :  { %v704_v39 = vpop.permute.xlu0 %703  ;;  %v695_v57 = vpop.permute.xlu1 %694 }
 0x2a7   :  { %v761_v8 = vrot.slane %v704_v39, %v1886_v4  ;;  %v747_v15 = vrot.slane %v695_v57, %v1893_v16 }
 0x2a9   :  { %v762_v37 = vsel %vm254_vm1, %v761_v8, %v757_v47  ;;  %v748_v27 = vsel %vm261_vm2, %v747_v15, %v743_v51  ;;  %v1421_v15 = vld [vmem:[%s2222_s2 + $0x25] ss:$0 sm:$0xff] }
 0x2aa   :  { %v707_v58 = vpop.permute.xlu0 %706  ;;  %v713_v30 = vpop.permute.xlu1 %712 }
 0x2ab   :  { %v766_v20 = vrot.slane %v707_v58, %v1893_v16  ;;  %v776_v48 = vrot.slane %v713_v30, %v1881_v2 }
 0x2ad   :  { %v767_v50 = vsel %vm261_vm2, %v766_v20, %v762_v37 }
 0x2ae   :  { %v716_v60 = vpop.permute.xlu0 %715 }
 0x2af   :  { %v780_v21 = vrot.slane %v716_v60, %v1886_v4 }
 0x2b1   :  { %v781_v44 = vsel %vm254_vm1, %v780_v21, %v776_v48 }
 0x2bc   :  { %v698_v52 = vpop.permute.xlu1 %697 }
 0x2bd   :  { %v710_v24 = vpop.permute.xlu0 %709  ;;  %v752_v41 = vrot.slane %v698_v52, %v1904_v22 }
 0x2be   :  { %v771_v17 = vrot.slane %v710_v24, %v1904_v22  ;;  %v203_v24 = vld [vmem:[%s2222_s2 + $0x20] sm:$0x3] }
 0x2bf   :  { %v753_v45 = vsel %vm268_vm3, %v752_v41, %v748_v27 }
 0x2c0   :  { %v719_v3 = vpop.permute.xlu1 %718  ;;  %v772_v32 = vsel %vm268_vm3, %v771_v17, %v767_v50 }
 0x2c1   :  { %v725_v40 = vpop.permute.xlu0 %724  ;;  %v785_v25 = vrot.slane %v719_v3, %v1893_v16  ;;  %v811_v57 = vsel %vm327_vm4, %v772_v32, %v753_v45  ;;  %v1418_v3 = vld [vmem:[%s2222_s2 + $0x26] ss:$0 sm:$0xff] }
 0x2c2   :  { %v795_v29 = vrot.slane %v725_v40, %v1881_v2 }
 0x2c3   :  { %v786_v11 = vsel %vm261_vm2, %v785_v25, %v781_v44 }
 0x2c4   :  { %v728_v7 = vpop.permute.xlu1 %727 }
 0x2c5   :  { %v722_v53 = vpop.permute.xlu0 %721  ;;  %v799_v6 = vrot.slane %v728_v7, %v1886_v4 }
 0x2c6   :  { %v790_v31 = vrot.slane %v722_v53, %v1904_v22 }
 0x2c7   :  { %v800_v56 = vsel %vm254_vm1, %v799_v6, %v795_v29 }
 0x2c8   :  { %v731_v33 = vpop.permute.xlu1 %730  ;;  %v791_v35 = vsel %vm268_vm3, %v790_v31, %v786_v11 }
 0x2c9   :  { %v804_v46 = vrot.slane %v731_v33, %v1893_v16  ;;  %v734_v55 = vpop.permute.xlu0 %733  ;;  %v812_v60 = vsel %vm329_vm5, %v791_v35, %v811_v57 }
 0x2ca   :  { %v809_v39 = vrot.slane %v734_v55, %v1904_v22 }
 0x2cb   :  { %v805_v58 = vsel %vm261_vm2, %v804_v46, %v800_v56 }
 0x2cc   :  { %v810_v30 = vsel %vm268_vm3, %v809_v39, %v805_v58 }
 0x2cd   :  { %v813_v52 = vsel %vm331_vm6, %v810_v30, %v812_v60 }
 0x2ce   :  { %1457 = vmatmul.mubr.msk.f32.vlgmr.msra.gmra.mrb[0].mxu1 %vm333_vm7, %v813_v52 }
 0x2cf   :  { %1461 = vmatprep.mubr.msk.f32.mxu1 %vm1580_vm0, %v1581_v61  ;;  %1460 = vmatpush3.msk.msra.mxu1 %vm898_vm8, %v203_v24 }
 0x2d0   :  { %1469 = vmatprep.subr.mxu1 %v1581_v61 }
 0x3a1   :  { %v885_v40 = vpop.f32.mrb[0].mxu1 }
 0x3a2   :  { %v886_v36 = vadd.f32 %v1418_v3, %v885_v40  ;;  %v1458_v5 = vpop.f32.mrb[1].mxu1 }
 0x3a4   :  { %v889_v8 = vmax.f32 %v886_v36, 0.0 }
 0x3a6   :  { %1462 = vmatmul.mubr.msk.f32.vlgmr.msra.gmra.mrb[2].mxu1 %vm894_vm9, %v889_v8 }
 0x3a7   :  { %1471 = vmatprep.mubr.msk.f32.mxu1 %vm1580_vm0, %v1581_v61 }
 0x479   :  { %v968_v20 = vpop.f32.mrb[2].mxu1 }
 0x47a   :  { %v969_v21 = vadd.f32 %v1421_v15, %v968_v20  ;;  %v1463_v47 = vpop.f32.mrb[3].mxu1 }
 0x47c   :  { %v1424_v41 = vmul.f32 -1.442695, %v969_v21 }
 0x47e   :  { %1551 = vpow2.f32 %v1424_v41 }
 0x488   :  { %v1552_v17 = vpop.eup %1551 }
 0x489   :  { %v975_v25 = vadd.f32 1.0, %v1552_v17 }
 0x48b   :  { %1553 = vrcp.f32 %v975_v25 }
 0x495   :  { %v1554_v7 = vpop.eup %1553 }
 0x496   :  { %v982_v48 = vrot.slane %v1554_v7, %v409_v62  ;;  %v1001_v61 = vrot.slane %v1554_v7, %v428_v1  ;;  %v1020_v53 = vrot.slane %v1554_v7, %v447_v14  ;;  %v1039_v51 = vrot.slane %v1554_v7, %v466_v12 }
 0x498   :  { %988 = vbcast.lane.b32.xlu0 %v982_v48, 264  ;;  %984 = vbcast.lane.b32.xlu1 %v982_v48, 256 }
 0x49c   :  { %1007 = vbcast.lane.b32.xlu0 %v1001_v61, 264  ;;  %1003 = vbcast.lane.b32.xlu1 %v1001_v61, 256 }
 0x4a0   :  { %1026 = vbcast.lane.b32.xlu0 %v1020_v53, 264  ;;  %1022 = vbcast.lane.b32.xlu1 %v1020_v53, 256 }
 0x4a4   :  { %1045 = vbcast.lane.b32.xlu0 %v1039_v51, 264  ;;  %1041 = vbcast.lane.b32.xlu1 %v1039_v51, 256 }
 0x4a8   :  { %1011 = vbcast.lane.b32.xlu0 %v1001_v61, 272  ;;  %992 = vbcast.lane.b32.xlu1 %v982_v48, 272 }
 0x4ac   :  { %1049 = vbcast.lane.b32.xlu0 %v1039_v51, 272  ;;  %1030 = vbcast.lane.b32.xlu1 %v1020_v53, 272 }
 0x4b0   :  { %1015 = vbcast.lane.b32.xlu0 %v1001_v61, 280  ;;  %996 = vbcast.lane.b32.xlu1 %v982_v48, 280 }
 0x4b4   :  { %1053 = vbcast.lane.b32.xlu0 %v1039_v51, 280  ;;  %1034 = vbcast.lane.b32.xlu1 %v1020_v53, 280 }
 0x50a   :  { %v989_v62 = vpop.permute.xlu0 %988  ;;  %v985_v1 = vpop.permute.xlu1 %984 }
 0x50b   :  { %v1072_v29 = vmul.f32 %v989_v62, %v2025_v42  ;;  %v1071_v33 = vmul.f32 %v985_v1, %v2029_v49 }
 0x50e   :  { %v1008_v37 = vpop.permute.xlu0 %1007  ;;  %v1004_v6 = vpop.permute.xlu1 %1003 }
 0x50f   :  { %v1076_v35 = vmul.f32 %v1008_v37, %v2039_v63  ;;  %v1075_v46 = vmul.f32 %v1004_v6, %v2035_v28 }
 0x512   :  { %v1027_v14 = vpop.permute.xlu0 %1026  ;;  %v1023_v31 = vpop.permute.xlu1 %1022 }
 0x513   :  { %v1080_v27 = vmul.f32 %v1027_v14, %v2055_v13  ;;  %v1079_v59 = vmul.f32 %v1023_v31, %v2050_v10 }
 0x515   :  { %1099 = vperm.xlu0 %1485, %v1080_v27   ;;  %1096 = vperm.xlu1 %1486, %v1079_v59  }
 0x516   :  { %v1046_v12 = vpop.permute.xlu0 %1045  ;;  %v1042_v50 = vpop.permute.xlu1 %1041 }
 0x517   :  { %v1084_v44 = vmul.f32 %v1046_v12, %v2075_v23  ;;  %v1083_v45 = vmul.f32 %v1042_v50, %v2070_v18 }
 0x519   :  { %1111 = vperm.xlu0 %1485, %v1084_v44   ;;  %1108 = vperm.xlu1 %1486, %v1083_v45  }
 0x51a   :  { %v1012_v32 = vpop.permute.xlu0 %1011  ;;  %v993_v11 = vpop.permute.xlu1 %992 }
 0x51b   :  { %v1077_v42 = vmul.f32 %v1012_v32, %v2047_v9  ;;  %v1073_v49 = vmul.f32 %v993_v11, %v2042_v0  ;;  %v210_v9 = vld [vmem:[%s2222_s2 + $0x30] sm:$0xff]  ;;  %v209_v0 = vld [vmem:[%s2222_s2 + $0x28] sm:$0xff] }
 0x51c   :  { %1465 = vmatpush3.xpose.msk.msra.mxu0 %vm333_vm7, %v210_v9  ;;  %1470 = vmatpush3.xpose.msk.msra.mxu1 %vm333_vm7, %v209_v0 }
 0x51d   :  { %1245 = vperm.xlu0 %1485, %v1072_v29   ;;  %1242 = vperm.xlu1 %1486, %v1071_v33  }
 0x51e   :  { %v1050_v13 = vpop.permute.xlu0 %1049  ;;  %v1031_v10 = vpop.permute.xlu1 %1030 }
 0x51f   :  { %v1085_v55 = vmul.f32 %v1050_v13, %v2083_v34  ;;  %v1081_v56 = vmul.f32 %v1031_v10, %v2067_v19 }
 0x521   :  { %1257 = vperm.xlu0 %1485, %v1076_v35   ;;  %1254 = vperm.xlu1 %1486, %v1075_v46  }
 0x522   :  { %v1016_v23 = vpop.permute.xlu0 %1015  ;;  %v997_v18 = vpop.permute.xlu1 %996 }
 0x523   :  { %v1078_v34 = vmul.f32 %v1016_v23, %v2062_v38  ;;  %v1074_v19 = vmul.f32 %v997_v18, %v2059_v43 }
 0x525   :  { %1114 = vperm.xlu0 %1485, %v1085_v55   ;;  %1102 = vperm.xlu1 %1486, %v1081_v56  }
 0x526   :  { %v1054_v39 = vpop.permute.xlu0 %1053  ;;  %v1035_v57 = vpop.permute.xlu1 %1034 }
 0x527   :  { %v1086_v28 = vmul.f32 %v1054_v39, %v2086_v26  ;;  %v1082_v63 = vmul.f32 %v1035_v57, %v2078_v54 }
 0x529   :  { %1260 = vperm.xlu0 %1485, %v1077_v42   ;;  %1248 = vperm.xlu1 %1486, %v1073_v49  }
 0x52d   :  { %1117 = vperm.xlu0 %1485, %v1086_v28   ;;  %1105 = vperm.xlu1 %1486, %v1082_v63  }
 0x531   :  { %1263 = vperm.xlu0 %1485, %v1078_v34   ;;  %1251 = vperm.xlu1 %1486, %v1074_v19  }
 0x594   :  { %v1100_v54 = vpop.permute.xlu0 %1099  ;;  %v1097_v26 = vpop.permute.xlu1 %1096 }
 0x595   :  { %v1126_v40 = vrot.slane %v1100_v54, %v1886_v4  ;;  %v1122_v36 = vrot.slane %v1097_v26, %v1881_v2 }
 0x597   :  { %v1127_v41 = vsel %vm254_vm1, %v1126_v40, %v1122_v36 }
 0x598   :  { %v1112_v58 = vpop.permute.xlu0 %1111  ;;  %v1109_v38 = vpop.permute.xlu1 %1108 }
 0x599   :  { %v1145_v5 = vrot.slane %v1112_v58, %v1886_v4  ;;  %v1141_v8 = vrot.slane %v1109_v38, %v1881_v2 }
 0x59b   :  { %v1146_v17 = vsel %vm254_vm1, %v1145_v5, %v1141_v8 }
 0x59c   :  { %v1246_v30 = vpop.permute.xlu0 %1245  ;;  %v1243_v43 = vpop.permute.xlu1 %1242 }
 0x59d   :  { %v1272_v25 = vrot.slane %v1246_v30, %v1886_v4  ;;  %v1268_v7 = vrot.slane %v1243_v43, %v1881_v2 }
 0x59f   :  { %v1273_v50 = vsel %vm254_vm1, %v1272_v25, %v1268_v7 }
 0x5a0   :  { %v1258_v60 = vpop.permute.xlu0 %1257  ;;  %v1255_v52 = vpop.permute.xlu1 %1254 }
 0x5a1   :  { %v1291_v53 = vrot.slane %v1258_v60, %v1886_v4  ;;  %v1287_v51 = vrot.slane %v1255_v52, %v1881_v2 }
 0x5a3   :  { %v1292_v44 = vsel %vm254_vm1, %v1291_v53, %v1287_v51 }
 0x5a4   :  { %v1115_v24 = vpop.permute.xlu0 %1114  ;;  %v1103_v3 = vpop.permute.xlu1 %1102 }
 0x5a5   :  { %v1150_v21 = vrot.slane %v1115_v24, %v1893_v16  ;;  %v1131_v47 = vrot.slane %v1103_v3, %v1893_v16 }
 0x5a7   :  { %v1151_v37 = vsel %vm261_vm2, %v1150_v21, %v1146_v17  ;;  %v1132_v6 = vsel %vm261_vm2, %v1131_v47, %v1127_v41 }
 0x5a8   :  { %v1261_v15 = vpop.permute.xlu0 %1260  ;;  %v1249_v20 = vpop.permute.xlu1 %1248 }
 0x5a9   :  { %v1296_v14 = vrot.slane %v1261_v15, %v1893_v16  ;;  %v1277_v31 = vrot.slane %v1249_v20, %v1893_v16 }
 0x5ab   :  { %v1297_v16 = vsel %vm261_vm2, %v1296_v14, %v1292_v44  ;;  %v1278_v11 = vsel %vm261_vm2, %v1277_v31, %v1273_v50 }
 0x5ac   :  { %v1118_v48 = vpop.permute.xlu0 %1117  ;;  %v1106_v61 = vpop.permute.xlu1 %1105 }
 0x5ad   :  { %v1155_v62 = vrot.slane %v1118_v48, %v1904_v22  ;;  %v1136_v1 = vrot.slane %v1106_v61, %v1904_v22 }
 0x5af   :  { %v1156_v27 = vsel %vm268_vm3, %v1155_v62, %v1151_v37  ;;  %v1137_v59 = vsel %vm268_vm3, %v1136_v1, %v1132_v6 }
 0x5b0   :  { %v1264_v12 = vpop.permute.xlu0 %1263  ;;  %v1252_v4 = vpop.permute.xlu1 %1251  ;;  %v1157_v2 = vsel %vm327_vm4, %v1156_v27, %v1137_v59 }
 0x5b1   :  { %v1301_v45 = vrot.slane %v1264_v12, %v1904_v22  ;;  %v1282_v32 = vrot.slane %v1252_v4, %v1904_v22  ;;  %1467 = vmatmul.mubr.msk.f32.vlgmr.msra.gmra.mrb[2].mxu0 %vm333_vm7, %v1157_v2  ;;  %v1429_v22 = vld [vmem:[%s2222_s2 + $0x27] ss:$0 sm:$0xff] }
 0x5b3   :  { %v1302_v29 = vsel %vm268_vm3, %v1301_v45, %v1297_v16  ;;  %v1283_v33 = vsel %vm268_vm3, %v1282_v32, %v1278_v11 }
 0x5b4   :  { %v1303_v13 = vsel %vm327_vm4, %v1302_v29, %v1283_v33 }
 0x5b5   :  { %1472 = vmatmul.mubr.msk.f32.vlgmr.msra.gmra.mrb[4].mxu1 %vm333_vm7, %v1303_v13 }
 0x684   :  { %v1229_v10 = vpop.f32.mrb[2].mxu0 }
 0x685   :  { %v1468_v35 = vpop.f32.mrb[3].mxu0 }
 0x688   :  { %v1375_v46 = vpop.f32.mrb[4].mxu1 }
 0x689   :  { %v1376_v23 = vadd.f32 %v1375_v46, %v1229_v10  ;;  %v1473_v18 = vpop.f32.mrb[5].mxu1 }
 0x68b   :  { %v1383_v55 = vadd.f32 %v1429_v22, %v1376_v23 }
 0x68d   :  { %1385 = vst.msk [vmem:[#allocation2] sm:$0x3] %vm1384_vm10, %v1383_v55 }
 0x68e   :  { %1566 = shalt.err (!%p1563_p4)
}
 0x68f   :  { %s1567_s2 = scalar_lea.hbm %s2223_s3, 32 }
 0x690   :  { %p1568_p5 = scmp.ne.s32.totalorder %s2223_s3, %s1567_s2  ;;  %p1571_p6 = scmp.lt.u32.totalorder %s1567_s2, %s2223_s3 }
 0x692   :  { %p1573_p7 = pnand %p1571_p6, %p1568_p5 }
 0x694   :  { %1576 = shalt.err (!%p1573_p7)
}
 0x695   :  { %1395 = dma.vmem_to_hbm [thread:$0]  %s1393_s6, 32, %s2223_s3, [#allocation3]  }
 0x696   :  { %1577 = dma.done.wait [#allocation3], 32  }
 0x697   :  { %1578 = vsyncadd [#allocation3], 4294967264 }
 0x698   :  { %1399 = vsyncpa [#allocation3], 1 }

</bundles_post_ra>
